<compile_context>
chip_gen: v7x
topology: tpu7x:2x2x1
jax: 0.10.0
libtpu: 0.0.40
codegen_flags: <defaults>
</compile_context>

<pallas_src>
import math

import numpy as np
import jax
import jax.numpy as jnp
from jax.experimental import pallas as pl
from jax.experimental.pallas import tpu as pltpu


def _gaussian_kernel_np(k_size=5, sigma=1.0):
    # Exact replica of SparseMapGenerator.init_gaussian_filter (bias = 0).
    center = k_size // 2
    x, y = np.mgrid[0 - center:k_size - center, 0 - center:k_size - center]
    gk = (1.0 / (2.0 * np.pi * sigma)
          * np.exp(-(np.square(x) + np.square(y)) / (2.0 * np.square(sigma))))
    return gk.astype(np.float32)


def _conv_matrix_np(H, W, gk):
    """(H*W, H*W) matrix MT s.t. (m_flat @ MT) == 'same'-padded 2D conv with gk."""
    k = int(gk.shape[0])
    pad = k // 2
    MT = np.zeros((H * W, H * W), np.float32)   # [input_pixel, output_pixel]
    for i in range(H):
        for j in range(W):
            p = i * W + j
            for di in range(k):
                for dj in range(k):
                    ii = i + di - pad
                    jj = j + dj - pad
                    if 0 <= ii < H and 0 <= jj < W:
                        MT[ii * W + jj, p] = gk[di, dj]
    return MT


def _build_kernel(C, HW, threshold, smooth):
    # NOTE: every closed-over value here is a plain Python int/float/bool so
    # nothing becomes a captured jaxpr constant.
    use_threshold = bool(threshold)
    thr = float(threshold) if use_threshold else 0.0
    # Non-smooth path: compare pre-sigmoid values against logit(thr) (exact).
    use_logit = (not smooth) and use_threshold and (0.0 < thr < 1.0)
    logit_thr = math.log(thr / (1.0 - thr)) if use_logit else 0.0

    def channel_max(conf_ref):
        # conf_ref block: (LB, C*HW); channels are contiguous, 128-aligned
        # lane slices -> channel max is pure VPU, no relayout.
        m = conf_ref[:, 0:HW]
        for c in range(1, C):
            m = jnp.maximum(m, conf_ref[:, c * HW:(c + 1) * HW])
        return m.astype(jnp.float32)

    def finish(mask, flag_ref, mask_ref, sum_ref):
        # pre-override per-agent sums, broadcast to a lane-dense (LB, 128) block
        sums = jnp.sum(mask, axis=1, keepdims=True)
        sum_ref[...] = jnp.broadcast_to(sums, sum_ref.shape)
        # fold the per-sample "first agent -> all ones" override into the value
        mask_ref[...] = jnp.maximum(mask, flag_ref[:, 0:1])

    if smooth:
        def kernel(conf_ref, mt_ref, flag_ref, mask_ref, sum_ref):
            m = jax.nn.sigmoid(channel_max(conf_ref))                  # (LB, HW)
            # 5x5 gaussian 'same' conv as one MXU matmul (f32, exact).
            sm = jnp.dot(m, mt_ref[...], preferred_element_type=jnp.float32)
            if use_threshold:
                mask = jnp.where(sm > thr, 1.0, 0.0).astype(jnp.float32)
            else:
                mask = jnp.ones_like(sm)
            finish(mask, flag_ref, mask_ref, sum_ref)
    else:
        def kernel(conf_ref, flag_ref, mask_ref, sum_ref):
            m = channel_max(conf_ref)
            if not use_threshold:
                mask = jnp.ones_like(m)
            elif use_logit:
                # sigmoid(m) > thr  <=>  m > logit(thr): no EUP work at all.
                mask = jnp.where(m > logit_thr, 1.0, 0.0).astype(jnp.float32)
            else:
                mask = jnp.where(jax.nn.sigmoid(m) > thr, 1.0, 0.0).astype(jnp.float32)
            finish(mask, flag_ref, mask_ref, sum_ref)

    return kernel


def sparse_map_generator(batch_confidence_maps, threshold, k_size=5,
                         c_sigma=1.0, smooth=True, agents_per_block=256):
    """Eval-mode forward of SparseMapGenerator.

    batch_confidence_maps: list of B arrays, each (L_b, C, H, W) float32.
    Returns (sparse_masks: (sum L_b, 1, H, W), sparse_rate: scalar).
    """
    B = len(batch_confidence_maps)
    Ls = [int(cm.shape[0]) for cm in batch_confidence_maps]
    L_total = sum(Ls)
    _, C, H, W = (int(d) for d in batch_confidence_maps[0].shape)
    HW = H * W

    # Tile sizing: big agent blocks amortize per-step pipeline overhead and
    # fill the MXU M dimension, but keep >= 2 grid steps when there is enough
    # work so both v7x TensorCores can be used.
    LB = max(8, (int(agents_per_block) // 8) * 8)
    half8 = max(8, ((-(-L_total // 2)) + 7) // 8 * 8)
    LB = min(LB, half8)
    L_pad = -(-L_total // LB) * LB

    # (sum L_b, C, H, W) -> (L_pad, C*H*W): pure reshape (no transpose, no
    # extra HBM pass); padding rows folded into the single concatenate.
    parts = [cm.reshape(Lb, C * HW).astype(jnp.float32)
             for cm, Lb in zip(batch_confidence_maps, Ls)]
    if L_pad != L_total:
        parts.append(jnp.zeros((L_pad - L_total, C * HW), jnp.float32))
    conf = jnp.concatenate(parts, axis=0) if len(parts) > 1 else parts[0]

    # per-agent first-of-sample flag, lane-dense (no 1-lane masked DMAs).
    starts_np = np.cumsum([0] + Ls)[:-1].astype(np.int64)
    flag_np = np.zeros((L_pad, 128), np.float32)
    flag_np[starts_np, :] = 1.0
    flag = jnp.asarray(flag_np)

    kernel = _build_kernel(C, HW, float(threshold) if threshold else 0.0, smooth)

    in_specs = [pl.BlockSpec((LB, C * HW), lambda i: (i, 0))]
    inputs = [conf]
    if smooth:
        gk = _gaussian_kernel_np(k_size, c_sigma)
        mt = jnp.asarray(_conv_matrix_np(H, W, gk))                  # (HW, HW) f32
        in_specs.append(pl.BlockSpec((HW, HW), lambda i: (0, 0)))    # constant block
        inputs.append(mt)
    in_specs.append(pl.BlockSpec((LB, 128), lambda i: (i, 0)))
    inputs.append(flag)

    grid = (L_pad // LB,)

    # Scheduling hint for XLA around the custom call.
    flops = (2 * L_pad * HW * HW if smooth else 0) + 8 * L_pad * HW
    transcendentals = L_pad * HW if smooth else 0
    bytes_accessed = 4 * (L_pad * C * HW + L_pad * HW + 2 * L_pad * 128
                          + (HW * HW if smooth else 0))

    # Only raise the scoped-VMEM limit if the (double-buffered) working set
    # actually needs it; defaults are fine at these sizes.
    vmem_est = 4 * (2 * LB * C * HW + 2 * LB * HW + 4 * LB * 128
                    + (2 * HW * HW if smooth else 0))
    cp_kwargs = dict(dimension_semantics=("parallel",))
    if vmem_est > 30 * (1 << 20):
        cp_kwargs["vmem_limit_bytes"] = int(vmem_est * 5 // 4)

    masks_flat, sums = pl.pallas_call(
        kernel,
        out_shape=(
            jax.ShapeDtypeStruct((L_pad, HW), jnp.float32),
            jax.ShapeDtypeStruct((L_pad, 128), jnp.float32),
        ),
        grid_spec=pltpu.PrefetchScalarGridSpec(
            num_scalar_prefetch=0,
            grid=grid,
            in_specs=in_specs,
            out_specs=(
                pl.BlockSpec((LB, HW), lambda i: (i, 0)),    # lane-dense mask
                pl.BlockSpec((LB, 128), lambda i: (i, 0)),   # lane-dense sums
            ),
        ),
        compiler_params=pltpu.CompilerParams(**cp_kwargs),
        cost_estimate=pl.CostEstimate(
            flops=int(flops),
            transcendentals=int(transcendentals),
            bytes_accessed=int(bytes_accessed)),
    )(*inputs)

    sparse_masks = masks_flat[:L_total].reshape(L_total, 1, H, W)
    agent_sums = sums[:L_total, 0]                                   # pre-override

    # per-sample rate (pre-override) then mean over the batch, via one segment-sum.
    seg_ids = jnp.asarray(np.repeat(np.arange(B, dtype=np.int32), Ls))
    per_sample = jax.ops.segment_sum(agent_sums, seg_ids, num_segments=B)
    denom = jnp.asarray([Lb * H * W for Lb in Ls], dtype=jnp.float32)
    sparse_rate = jnp.mean(per_sample / denom)
    return sparse_masks, sparse_rate


if __name__ == "__main__":
    key = jax.random.PRNGKey(0)
    B = 2
    C, H, W = 4, 16, 16
    Ls = [3, 2]

    keys = jax.random.split(key, B)
    batch_confidence_maps = [
        jax.random.normal(keys[b], (Ls[b], C, H, W), dtype=jnp.float32)
        for b in range(B)
    ]

    sparse_masks, sparse_rate = sparse_map_generator(
        batch_confidence_maps, threshold=0.6, k_size=5, c_sigma=1.0, smooth=True)

    sparse_masks = jax.block_until_ready(sparse_masks)
    sparse_rate = jax.block_until_ready(sparse_rate)

    assert sparse_masks.shape == (sum(Ls), 1, H, W)
    assert sparse_masks.dtype == jnp.float32
    # mask values are binary
    assert bool(jnp.all((sparse_masks == 0.0) | (sparse_masks == 1.0)))
    # first agent of EACH sample is forced to ones (per-sample sparse_mask[0] = 1)
    assert bool(jnp.all(sparse_masks[0] == 1.0))
    assert bool(jnp.all(sparse_masks[Ls[0]] == 1.0))
    assert 0.0 <= float(sparse_rate) <= 1.0

    # also exercise the non-smooth (logit-threshold) path once
    nm_masks, nm_rate = sparse_map_generator(
        batch_confidence_maps, threshold=0.6, smooth=False)
    nm_masks = jax.block_until_ready(nm_masks)
    assert nm_masks.shape == (sum(Ls), 1, H, W)
    assert bool(jnp.all((nm_masks == 0.0) | (nm_masks == 1.0)))
    assert 0.0 <= float(jax.block_until_ready(nm_rate)) <= 1.0

    print("KERNEL_OK")
</pallas_src>

<mosaic_0001>
module attributes {stable_mosaic.version = 11 : i64} {
  func.func @kernel(%arg0: i32, %arg1: memref<8x1024xf32, #tpu.memory_space<vmem>>, %arg2: memref<256x256xf32, #tpu.memory_space<vmem>>, %arg3: memref<8x128xf32, #tpu.memory_space<vmem>>, %arg4: memref<8x256xf32, #tpu.memory_space<vmem>>, %arg5: memref<8x128xf32, #tpu.memory_space<vmem>>) attributes {dimension_semantics = [#tpu.dimension_semantics<parallel>], iteration_bounds = array<i64: 1>, scalar_prefetch = 0 : i64, scratch_operands = 0 : i64, tpu.core_type = #tpu.core_type<tc>, window_params = [{transform_indices = @transform_0, window_bounds = array<i64: 8, 1024>}, {pipeline_mode = #tpu.pipeline_mode<synchronous>, transform_indices = @transform_1, window_bounds = array<i64: 256, 256>}, {transform_indices = @transform_2, window_bounds = array<i64: 8, 128>}, {transform_indices = @transform_3, window_bounds = array<i64: 8, 256>}, {transform_indices = @transform_4, window_bounds = array<i64: 8, 128>}]} {
    %c0 = arith.constant 0 : index
    %c0_0 = arith.constant 0 : index
    %0 = vector.load %arg1[%c0, %c0_0] : memref<8x1024xf32, #tpu.memory_space<vmem>>, vector<8x256xf32>
    %c0_1 = arith.constant 0 : index
    %c256 = arith.constant 256 : index
    %1 = vector.load %arg1[%c0_1, %c256] : memref<8x1024xf32, #tpu.memory_space<vmem>>, vector<8x256xf32>
    %2 = arith.maximumf %0, %1 : vector<8x256xf32>
    %c0_2 = arith.constant 0 : index
    %c512 = arith.constant 512 : index
    %3 = vector.load %arg1[%c0_2, %c512] : memref<8x1024xf32, #tpu.memory_space<vmem>>, vector<8x256xf32>
    %4 = arith.maximumf %2, %3 : vector<8x256xf32>
    %c0_3 = arith.constant 0 : index
    %c768 = arith.constant 768 : index
    %5 = vector.load %arg1[%c0_3, %c768] : memref<8x1024xf32, #tpu.memory_space<vmem>>, vector<8x256xf32>
    %6 = arith.maximumf %4, %5 : vector<8x256xf32>
    %7 = arith.negf %6 : vector<8x256xf32>
    %8 = math.exp %7 : vector<8x256xf32>
    %cst = arith.constant 1.000000e+00 : f32
    %9 = vector.broadcast %cst : f32 to vector<8x256xf32>
    %10 = arith.addf %9, %8 : vector<8x256xf32>
    %11 = arith.divf %9, %10 : vector<8x256xf32>
    %c0_4 = arith.constant 0 : index
    %c0_5 = arith.constant 0 : index
    %12 = vector.load %arg2[%c0_4, %c0_5] : memref<256x256xf32, #tpu.memory_space<vmem>>, vector<256x256xf32>
    %cst_6 = arith.constant dense<0.000000e+00> : vector<8x256xf32>
    %13 = tpu.matmul %11, %12, %cst_6 {dimension_numbers = #tpu.dot_dimension_numbers<[1], [0], [0], [1], [0, 0, 1, 1], [], []>} : vector<8x256xf32>, vector<256x256xf32>, vector<8x256xf32> -> vector<8x256xf32>
    %cst_7 = arith.constant 6.000000e-01 : f32
    %14 = vector.broadcast %cst_7 : f32 to vector<8x256xf32>
    %15 = arith.cmpf ogt, %13, %14 : vector<8x256xf32>
    %cst_8 = arith.constant 1.000000e+00 : f32
    %cst_9 = arith.constant 0.000000e+00 : f32
    %16 = vector.broadcast %cst_8 : f32 to vector<8x256xf32>
    %17 = vector.broadcast %cst_9 : f32 to vector<8x256xf32>
    %18 = arith.select %15, %16, %17 : vector<8x256xi1>, vector<8x256xf32>
    %cst_10 = arith.constant dense<0.000000e+00> : vector<8xf32>
    %19 = vector.multi_reduction <add>, %18, %cst_10 [1] : vector<8x256xf32> to vector<8xf32>
    %20 = vector.shape_cast %19 : vector<8xf32> to vector<8x1xf32>
    %21 = vector.shape_cast %20 : vector<8x1xf32> to vector<8x1xf32>
    %22 = vector.broadcast %21 : vector<8x1xf32> to vector<8x128xf32>
    %c0_11 = arith.constant 0 : index
    %c0_12 = arith.constant 0 : index
    %23 = vector.load %arg5[%c0_11, %c0_12] : memref<8x128xf32, #tpu.memory_space<vmem>>, vector<8x128xf32>
    tpu.vector_store %arg5[%c0_11, %c0_12], %22 {strides = array<i32>} : memref<8x128xf32, #tpu.memory_space<vmem>>, vector<8x128xf32>,
    %c0_13 = arith.constant 0 : index
    %c0_14 = arith.constant 0 : index
    %24 = vector.load %arg3[%c0_13, %c0_14] : memref<8x128xf32, #tpu.memory_space<vmem>>, vector<8x1xf32>
    %25 = vector.broadcast %24 : vector<8x1xf32> to vector<8x256xf32>
    %26 = arith.maximumf %18, %25 : vector<8x256xf32>
    %c0_15 = arith.constant 0 : index
    %c0_16 = arith.constant 0 : index
    %27 = vector.load %arg4[%c0_15, %c0_16] : memref<8x256xf32, #tpu.memory_space<vmem>>, vector<8x256xf32>
    tpu.vector_store %arg4[%c0_15, %c0_16], %26 {strides = array<i32>} : memref<8x256xf32, #tpu.memory_space<vmem>>, vector<8x256xf32>,
    return
  }
  func.func @transform_0(%arg0: i32) -> (i32, i32) {
    %c0_i32 = arith.constant 0 : i32
    %c0_i32_0 = arith.constant 0 : i32
    return %arg0, %c0_i32 : i32, i32
  }
  func.func @transform_1(%arg0: i32) -> (i32, i32) {
    %c0_i32 = arith.constant 0 : i32
    %c0_i32_0 = arith.constant 0 : i32
    %c0_i32_1 = arith.constant 0 : i32
    return %c0_i32, %c0_i32_0 : i32, i32
  }
  func.func @transform_2(%arg0: i32) -> (i32, i32) {
    %c0_i32 = arith.constant 0 : i32
    %c0_i32_0 = arith.constant 0 : i32
    return %arg0, %c0_i32 : i32, i32
  }
  func.func @transform_3(%arg0: i32) -> (i32, i32) {
    %c0_i32 = arith.constant 0 : i32
    %c0_i32_0 = arith.constant 0 : i32
    return %arg0, %c0_i32 : i32, i32
  }
  func.func @transform_4(%arg0: i32) -> (i32, i32) {
    %c0_i32 = arith.constant 0 : i32
    %c0_i32_0 = arith.constant 0 : i32
    return %arg0, %c0_i32 : i32, i32
  }
}

</mosaic_0001>

<bundles_post_ra>
// kernel: tpu_custom_call.1
= control target key start
LH: loop header
LB: loop body
LE: loop exit
PB: predicated region body
PF: predicated region fallthrough
CT: control target
= control target key end

     0   :  { %10 = vsyncpa [#allocation3], 0  ;;  %s560_s0 = inlined_call_operand.hbm [shape: f32[8,1024], index: 0, kind: input, shape index: {}]   ;;  %s561_s1 = inlined_call_operand.hbm [shape: f32[256,256], index: 1, kind: input, shape index: {}]   ;;  %s562_s2 = inlined_call_operand.hbm [shape: f32[8,128], index: 2, kind: input, shape index: {}]   ;;  %s563_s3 = inlined_call_operand.hbm [shape: f32[8,256], index: 3, kind: output, shape index: {0}]   ;;  %s564_s4 = inlined_call_operand.hbm [shape: f32[8,128], index: 4, kind: output, shape index: {1}]  }
   0x1   :  { %11 = vsyncpa [#allocation6], 0 }
   0x2   :  { %12 = vsyncpa [#allocation4], 0 }
   0x3   :  { %13 = vsyncpa [#allocation10], 0  ;;  %s466_s15 = smov [#allocation5]   ;;  %s348_s19 = scalar_lea.hbm %s561_s1, 8192 }
   0x4   :  { %s29_s16 = sshll.u32 %s466_s15, 4  ;;  %p349_p0 = scmp.ne.s32.totalorder %s561_s1, %s348_s19  ;;  %s30_s16 = int_to_ptr.vmem [resolvable:$true] %s29_s16 }
   0x5   :  { %p352_p1 = scmp.lt.u32.totalorder %s348_s19, %s561_s1 }
   0x7   :  { %p354_p2 = pnand %p352_p1, %p349_p0 }
   0x9   :  { %357 = shalt.err (!%p354_p2)
}
   0xa   :  { %s358_s24 = scalar_lea.vmem %s30_s16, 8192  ;;  %p363_p4 = scmp.lt.s32.totalorder %s30_s16, %s30_s16 }
   0xb   :  { %p359_p3 = scmp.ne.s32.totalorder %s30_s16, %s358_s24  ;;  %p364_p5 = scmp.lt.s32.totalorder %s358_s24, %s358_s24 }
   0xd   :  { %p365_p6 = por %p364_p5, %p363_p4 }
   0xf   :  { %p366_p7 = pnand %p365_p6, %p359_p3 }
  0x11   :  { %369 = shalt.err (!%p366_p7)
}
  0x12   :  { %s467_s25 = smov 256   ;;  %s468_s26 = smov 16  }
  0x13   :  { %35 = dma.hbm_to_vmem [thread:$0]  %s561_s1, 8192, %s30_s16, [#allocation6], %s467_s25, %s467_s25, %s468_s26  }
  0x14   :  { %s469_s29 = smov [#allocation2]   ;;  %s470_s5 = smov [#allocation7]  }
  0x15   :  { %s20_s30 = sshll.u32 %s469_s29, 4  ;;  %s42_s6 = sshll.u32 %s470_s5, 4  ;;  %s21_s30 = int_to_ptr.vmem [resolvable:$true] %s20_s30  ;;  %s43_s6 = int_to_ptr.vmem [resolvable:$true] %s42_s6 }
  0x16   :  { %s370_s9 = scalar_lea.hbm %s560_s0, 1024 }
  0x17   :  { %p371_p8 = scmp.ne.s32.totalorder %s560_s0, %s370_s9  ;;  %p374_p9 = scmp.lt.u32.totalorder %s370_s9, %s560_s0 }
  0x19   :  { %p376_p10 = pnand %p374_p9, %p371_p8 }
  0x1b   :  { %379 = shalt.err (!%p376_p10)
}
  0x1c   :  { %s380_s1 = scalar_lea.vmem %s21_s30, 1024  ;;  %p385_p12 = scmp.lt.s32.totalorder %s21_s30, %s21_s30 }
  0x1d   :  { %p381_p11 = scmp.ne.s32.totalorder %s21_s30, %s380_s1  ;;  %p386_p13 = scmp.lt.s32.totalorder %s380_s1, %s380_s1 }
  0x1f   :  { %p387_p0 = por %p386_p13, %p385_p12 }
  0x21   :  { %p388_p1 = pnand %p387_p0, %p381_p11 }
  0x23   :  { %391 = shalt.err (!%p388_p1)
}
  0x24   :  { %23 = dma.hbm_to_vmem [thread:$0]  %s560_s0, 1024, %s21_s30, [#allocation3]  }
  0x25   :  { %s392_s18 = scalar_lea.hbm %s562_s2, 128 }
  0x26   :  { %p393_p2 = scmp.ne.s32.totalorder %s562_s2, %s392_s18  ;;  %p396_p3 = scmp.lt.u32.totalorder %s392_s18, %s562_s2 }
  0x28   :  { %p398_p4 = pnand %p396_p3, %p393_p2 }
  0x2a   :  { %401 = shalt.err (!%p398_p4)
}
  0x2b   :  { %s402_s23 = scalar_lea.vmem %s43_s6, 128  ;;  %p407_p6 = scmp.lt.s32.totalorder %s43_s6, %s43_s6 }
  0x2c   :  { %p403_p5 = scmp.ne.s32.totalorder %s43_s6, %s402_s23  ;;  %p408_p7 = scmp.lt.s32.totalorder %s402_s23, %s402_s23 }
  0x2e   :  { %p409_p8 = por %p408_p7, %p407_p6 }
  0x30   :  { %p410_p9 = pnand %p409_p8, %p403_p5 }
  0x32   :  { %413 = shalt.err (!%p410_p9)
}
  0x33   :  { %45 = dma.hbm_to_vmem [thread:$0]  %s562_s2, 128, %s43_s6, [#allocation6]  }
  0x34   :  { %458 = dma.done.wait [#allocation3], 1024  }
  0x35   :  { %459 = vsyncadd [#allocation3], 4294966272 }
  0x36   :  { %460 = dma.done.wait [#allocation6], 8320  }
  0x37   :  { %461 = vsyncadd [#allocation6], 4294958976  ;;  %v82_v0 = vld [vmem:[#allocation5 + $0x8] sm:$0xff]  ;;  %v84_v1 = vld [vmem:[#allocation5 + $0x18] sm:$0xff]  ;;  %s473_s2 = smov [#allocation9]  }
  0x38   :  { %v81_v2 = vld [vmem:[#allocation5] sm:$0xff]  ;;  %v266_v3 = vpack.c.bf16 %v84_v1, %v82_v0  ;;  %v83_v4 = vld [vmem:[#allocation5 + $0x10] sm:$0xff]  ;;  %v86_v5 = vld [vmem:[#allocation5 + $0x28] sm:$0xff]  ;;  %s250_s25 = sshll.u32 %s473_s2, 4  ;;  %s251_s25 = int_to_ptr.vmem [resolvable:$true] %s250_s25 }
  0x39   :  { %v88_v6 = vld [vmem:[#allocation5 + $0x38] sm:$0xff]  ;;  %v268_v7 = vpack.c.bf16 %v83_v4, %v81_v2  ;;  %v85_v9 = vld [vmem:[#allocation5 + $0x20] sm:$0xff]  ;;  %v87_v10 = vld [vmem:[#allocation5 + $0x30] sm:$0xff]  ;;  %s414_s26 = scalar_lea.vmem %s251_s25, 128  ;;  %p419_p11 = scmp.lt.s32.totalorder %s251_s25, %s251_s25 }
  0x3a   :  { %v270_v8 = vpack.c.bf16 %v88_v6, %v86_v5  ;;  %v90_v11 = vld [vmem:[#allocation5 + $0x48] sm:$0xff]  ;;  %267 = vmatprep.subr.bf16.mxu0 %v266_v3  ;;  %v92_v12 = vld [vmem:[#allocation5 + $0x58] sm:$0xff]  ;;  %v272_v13 = vpack.c.bf16 %v87_v10, %v85_v9  ;;  %v89_v15 = vld [vmem:[#allocation5 + $0x40] sm:$0xff]  ;;  %p415_p10 = scmp.ne.s32.totalorder %s251_s25, %s414_s26  ;;  %p420_p12 = scmp.lt.s32.totalorder %s414_s26, %s414_s26 }
  0x3b   :  { %269 = vmatpush1.bf16.msra.mxu0 %v268_v7  ;;  %v274_v14 = vpack.c.bf16 %v92_v12, %v90_v11  ;;  %v91_v16 = vld [vmem:[#allocation5 + $0x50] sm:$0xff]  ;;  %v94_v17 = vld [vmem:[#allocation5 + $0x68] sm:$0xff]  ;;  %v96_v18 = vld [vmem:[#allocation5 + $0x78] sm:$0xff] }
  0x3c   :  { %271 = vmatprep.subr.bf16.mxu0 %v270_v8  ;;  %v276_v19 = vpack.c.bf16 %v91_v16, %v89_v15  ;;  %v278_v20 = vpack.c.bf16 %v96_v18, %v94_v17  ;;  %v93_v21 = vld [vmem:[#allocation5 + $0x60] sm:$0xff]  ;;  %v95_v22 = vld [vmem:[#allocation5 + $0x70] sm:$0xff]  ;;  %v98_v23 = vld [vmem:[#allocation5 + $0x88] sm:$0xff]  ;;  %p421_p13 = por %p420_p12, %p419_p11 }
  0x3d   :  { %v100_v24 = vld [vmem:[#allocation5 + $0x98] sm:$0xff]  ;;  %v280_v25 = vpack.c.bf16 %v95_v22, %v93_v21  ;;  %v97_v27 = vld [vmem:[#allocation5 + $0x80] sm:$0xff]  ;;  %v99_v28 = vld [vmem:[#allocation5 + $0x90] sm:$0xff] }
  0x3e   :  { %v282_v26 = vpack.c.bf16 %v100_v24, %v98_v23  ;;  %v102_v29 = vld [vmem:[#allocation5 + $0xa8] sm:$0xff]  ;;  %v104_v30 = vld [vmem:[#allocation5 + $0xb8] sm:$0xff]  ;;  %v284_v31 = vpack.c.bf16 %v99_v28, %v97_v27  ;;  %v101_v33 = vld [vmem:[#allocation5 + $0xa0] sm:$0xff]  ;;  %p422_p0 = pnand %p421_p13, %p415_p10 }
  0x3f   :  { %273 = vmatpush1.bf16.msra.mxu0 %v272_v13  ;;  %v286_v32 = vpack.c.bf16 %v104_v30, %v102_v29  ;;  %v103_v34 = vld [vmem:[#allocation5 + $0xb0] sm:$0xff]  ;;  %v106_v35 = vld [vmem:[#allocation5 + $0xc8] sm:$0xff]  ;;  %v108_v36 = vld [vmem:[#allocation5 + $0xd8] sm:$0xff] }
  0x40   :  { %275 = vmatprep.subr.bf16.mxu0 %v274_v14  ;;  %v288_v37 = vpack.c.bf16 %v103_v34, %v101_v33  ;;  %v105_v38 = vld [vmem:[#allocation5 + $0xc0] sm:$0xff]  ;;  %v107_v39 = vld [vmem:[#allocation5 + $0xd0] sm:$0xff]  ;;  %v290_v40 = vpack.c.bf16 %v108_v36, %v106_v35  ;;  %v110_v41 = vld [vmem:[#allocation5 + $0xe8] sm:$0xff] }
  0x41   :  { %v56_v42 = vld [vmem:[#allocation2 + $0x8] sm:$0xff]  ;;  %v58_v43 = vld [vmem:[#allocation2 + $0x18] sm:$0xff]  ;;  %v55_v47 = vld [vmem:[#allocation2] sm:$0xff]  ;;  %v292_v51 = vpack.c.bf16 %v107_v39, %v105_v38 }
  0x42   :  { %v112_v44 = vld [vmem:[#allocation5 + $0xf8] sm:$0xff]  ;;  %v60_v45 = vmax.f32 %v56_v42, %v58_v43  ;;  %v62_v46 = vld [vmem:[#allocation2 + $0x28] sm:$0xff]  ;;  %v57_v49 = vld [vmem:[#allocation2 + $0x10] sm:$0xff] }
  0x43   :  { %277 = vmatpush1.bf16.msra.mxu0 %v276_v19  ;;  %v66_v48 = vld [vmem:[#allocation2 + $0x38] sm:$0xff]  ;;  %v61_v50 = vld [vmem:[#allocation2 + $0x20] sm:$0xff]  ;;  %v59_v53 = vmax.f32 %v55_v47, %v57_v49  ;;  %v294_v54 = vpack.c.bf16 %v112_v44, %v110_v41  ;;  %v111_v56 = vld [vmem:[#allocation5 + $0xf0] sm:$0xff] }
  0x44   :  { %279 = vmatprep.subr.bf16.mxu0 %v278_v20  ;;  %v64_v52 = vmax.f32 %v60_v45, %v62_v46  ;;  %v109_v55 = vld [vmem:[#allocation5 + $0xe0] sm:$0xff]  ;;  %v114_v57 = vld [vmem:[#allocation5 + $0x108] sm:$0xff]  ;;  %v116_v58 = vld [vmem:[#allocation5 + $0x118] sm:$0xff] }
  0x45   :  { %v63_v60 = vmax.f32 %v59_v53, %v61_v50  ;;  %v65_v61 = vld [vmem:[#allocation2 + $0x30] sm:$0xff]  ;;  %v296_v62 = vpack.c.bf16 %v111_v56, %v109_v55  ;;  %v298_v0 = vpack.c.bf16 %v116_v58, %v114_v57  ;;  %v113_v1 = vld [vmem:[#allocation5 + $0x100] sm:$0xff]  ;;  %v118_v4 = vld [vmem:[#allocation5 + $0x128] sm:$0xff]  ;;  %v472_v57 = vmov 0.0  }
  0x46   :  { %v68_v59 = vmax.f32 %v64_v52, %v66_v48  ;;  %v115_v2 = vld [vmem:[#allocation5 + $0x110] sm:$0xff]  ;;  %v120_v5 = vld [vmem:[#allocation5 + $0x138] sm:$0xff]  ;;  %v117_v8 = vld [vmem:[#allocation5 + $0x120] sm:$0xff] }
  0x47   :  { %281 = vmatpush1.bf16.msra.mxu0 %v280_v25  ;;  %v67_v3 = vmax.f32 %v63_v60, %v65_v61  ;;  %v300_v6 = vpack.c.bf16 %v115_v2, %v113_v1  ;;  %v302_v7 = vpack.c.bf16 %v120_v5, %v118_v4  ;;  %v119_v9 = vld [vmem:[#allocation5 + $0x130] sm:$0xff]  ;;  %v122_v11 = vld [vmem:[#allocation5 + $0x148] sm:$0xff]  ;;  %v124_v12 = vld [vmem:[#allocation5 + $0x158] sm:$0xff] }
  0x48   :  { %283 = vmatprep.subr.bf16.mxu0 %v282_v26  ;;  %v265_v63 = vmul.f32 -1.442695, %v68_v59  ;;  %v304_v13 = vpack.c.bf16 %v119_v9, %v117_v8  ;;  %v306_v14 = vpack.c.bf16 %v124_v12, %v122_v11  ;;  %v121_v15 = vld [vmem:[#allocation5 + $0x140] sm:$0xff]  ;;  %v123_v16 = vld [vmem:[#allocation5 + $0x150] sm:$0xff]  ;;  %v126_v17 = vld [vmem:[#allocation5 + $0x168] sm:$0xff] }
  0x49   :  { %v264_v10 = vmul.f32 -1.442695, %v67_v3  ;;  %v128_v18 = vld [vmem:[#allocation5 + $0x178] sm:$0xff]  ;;  %v308_v20 = vpack.c.bf16 %v123_v16, %v121_v15  ;;  %v125_v22 = vld [vmem:[#allocation5 + $0x160] sm:$0xff]  ;;  %v127_v23 = vld [vmem:[#allocation5 + $0x170] sm:$0xff] }
  0x4a   :  { %340 = vpow2.f32 %v265_v63  ;;  %v310_v21 = vpack.c.bf16 %v128_v18, %v126_v17  ;;  %v130_v25 = vld [vmem:[#allocation5 + $0x188] sm:$0xff]  ;;  %v132_v26 = vld [vmem:[#allocation5 + $0x198] sm:$0xff]  ;;  %v312_v27 = vpack.c.bf16 %v127_v23, %v125_v22  ;;  %v129_v29 = vld [vmem:[#allocation5 + $0x180] sm:$0xff] }
  0x4b   :  { %285 = vmatpush1.bf16.msra.mxu0 %v284_v31  ;;  %342 = vpow2.f32 %v264_v10  ;;  %v314_v28 = vpack.c.bf16 %v132_v26, %v130_v25  ;;  %v131_v30 = vld [vmem:[#allocation5 + $0x190] sm:$0xff]  ;;  %v134_v31 = vld [vmem:[#allocation5 + $0x1a8] sm:$0xff]  ;;  %v133_v36 = vld [vmem:[#allocation5 + $0x1a0] sm:$0xff] }
  0x4c   :  { %287 = vmatprep.subr.bf16.mxu0 %v286_v32  ;;  %v136_v32 = vld [vmem:[#allocation5 + $0x1b8] sm:$0xff]  ;;  %v316_v34 = vpack.c.bf16 %v131_v30, %v129_v29  ;;  %v138_v38 = vld [vmem:[#allocation5 + $0x1c8] sm:$0xff]  ;;  %v137_v44 = vld [vmem:[#allocation5 + $0x1c0] sm:$0xff] }
  0x4d   :  { %v318_v35 = vpack.c.bf16 %v136_v32, %v134_v31  ;;  %v140_v39 = vld [vmem:[#allocation5 + $0x1d8] sm:$0xff]  ;;  %v139_v45 = vld [vmem:[#allocation5 + $0x1d0] sm:$0xff]  ;;  %v142_v46 = vld [vmem:[#allocation5 + $0x1e8] sm:$0xff] }
  0x4e   :  { %v322_v43 = vpack.c.bf16 %v140_v39, %v138_v38  ;;  %v144_v47 = vld [vmem:[#allocation5 + $0x1f8] sm:$0xff]  ;;  %v324_v48 = vpack.c.bf16 %v139_v45, %v137_v44  ;;  %v141_v50 = vld [vmem:[#allocation5 + $0x1e0] sm:$0xff] }
  0x4f   :  { %289 = vmatpush1.bf16.msra.mxu0 %v288_v37  ;;  %v135_v37 = vld [vmem:[#allocation5 + $0x1b0] sm:$0xff]  ;;  %v326_v49 = vpack.c.bf16 %v144_v47, %v142_v46  ;;  %v224_v61 = vld [vmem:[#allocation7] sm:$0xff] }
  0x50   :  { %291 = vmatprep.subr.bf16.mxu0 %v290_v40  ;;  %v320_v41 = vpack.c.bf16 %v135_v37, %v133_v36 }
  0x53   :  { %293 = vmatpush1.bf16.msra.mxu0 %v292_v51  ;;  %v143_v51 = vld [vmem:[#allocation5 + $0x1f0] sm:$0xff] }
  0x54   :  { %295 = vmatprep.subr.bf16.mxu0 %v294_v54  ;;  %v341_v19 = vpop.eup %340  ;;  %v328_v52 = vpack.c.bf16 %v143_v51, %v141_v50  ;;  %v471_v54 = vmov 0  }
  0x55   :  { %v76_v24 = vadd.f32 1.0, %v341_v19  ;;  %v343_v33 = vpop.eup %342  ;;  %339 = vset.pattern.permute.xlu0 %v471_v54 }
  0x56   :  { %v75_v40 = vadd.f32 1.0, %v343_v33 }
  0x57   :  { %297 = vmatpush1.bf16.msra.mxu0 %v296_v62  ;;  %344 = vrcp.f32 %v76_v24 }
  0x58   :  { %299 = vmatprep.subr.bf16.mxu0 %v298_v0  ;;  %346 = vrcp.f32 %v75_v40 }
  0x5b   :  { %301 = vmatpush1.bf16.msra.mxu0 %v300_v6 }
  0x5c   :  { %303 = vmatprep.subr.bf16.mxu0 %v302_v7 }
  0x5f   :  { %305 = vmatpush1.bf16.msra.mxu0 %v304_v13 }
  0x60   :  { %307 = vmatprep.subr.bf16.mxu0 %v306_v14 }
  0x61   :  { %v345_v42 = vpop.eup %344 }
  0x62   :  { %209 = vmatprep.mubr.f32.mxu0 %v345_v42  ;;  %v347_v53 = vpop.eup %346 }
  0x63   :  { %309 = vmatpush1.bf16.msra.mxu0 %v308_v20 }
  0x64   :  { %311 = vmatprep.subr.bf16.mxu0 %v310_v21 }
  0x67   :  { %313 = vmatpush1.bf16.msra.mxu0 %v312_v27 }
  0x68   :  { %315 = vmatprep.subr.bf16.mxu0 %v314_v28 }
  0x6b   :  { %317 = vmatpush1.bf16.msra.mxu0 %v316_v34 }
  0x6c   :  { %319 = vmatprep.subr.bf16.mxu0 %v318_v35 }
  0x6f   :  { %321 = vmatpush1.bf16.msra.mxu0 %v320_v41 }
  0x70   :  { %323 = vmatprep.subr.bf16.mxu0 %v322_v43 }
  0x73   :  { %325 = vmatpush1.bf16.msra.mxu0 %v324_v48 }
  0x74   :  { %327 = vmatprep.subr.bf16.mxu0 %v326_v49 }
  0x77   :  { %329 = vmatpush1.bf16.msra.mxu0 %v328_v52 }
  0x7a   :  { %210 = vmatmul.mubr.f32.vlgmr.msra.gmra.mrb[0].mxu0 %v347_v53 }
 0x14d   :  { %v211_v55 = vpop.f32.mrb[0].mxu0 }
 0x14e   :  { %vm216_vm0 = vcmp.gt.f32.partialorder %v211_v55, 0.6  ;;  %v213_v56 = vpop.f32.mrb[1].mxu0 }
 0x14f   :  { %vm217_vm1 = vcmp.gt.f32.partialorder %v213_v56, 0.6  ;;  %v218_v58 = vsel %vm216_vm0, 1.0, %v472_v57 }
 0x150   :  { %v219_v59 = vsel %vm217_vm1, 1.0, %v472_v57 }
 0x151   :  { %v220_v60 = vadd.f32 %v219_v59, %v218_v58 }
 0x153   :  { %221 = vadd.xlane.f32.xlu0 %v220_v60 }
 0x169   :  { %227 = vperm.xlu0 %339, %v224_v61  }
 0x1e0   :  { %v222_v62 = vpop.xlane.xlu0 %221 }
 0x1e1   :  { %223 = vst [vmem:[#allocation9] sm:$0xff] %v222_v62 }
 0x1e2   :  { %425 = shalt.err (!%p422_p0)
}
 0x1e3   :  { %s426_s29 = scalar_lea.hbm %s564_s4, 128 }
 0x1e4   :  { %p427_p1 = scmp.ne.s32.totalorder %s564_s4, %s426_s29  ;;  %p430_p2 = scmp.lt.u32.totalorder %s426_s29, %s564_s4 }
 0x1e6   :  { %p432_p3 = pnand %p430_p2, %p427_p1 }
 0x1e8   :  { %435 = shalt.err (!%p432_p3)
}
 0x1e9   :  { %253 = dma.vmem_to_hbm [thread:$0]  %s251_s25, 128, %s564_s4, [#allocation10]   ;;  %v228_v63 = vpop.permute.xlu0 %227 }
 0x1ea   :  { %s474_s10 = smov [#allocation8]   ;;  %v230_v0 = vmax.f32 %v218_v58, %v228_v63  ;;  %v231_v1 = vmax.f32 %v219_v59, %v228_v63 }
 0x1eb   :  { %s240_s11 = sshll.u32 %s474_s10, 4  ;;  %s241_s11 = int_to_ptr.vmem [resolvable:$true] %s240_s11 }
 0x1ec   :  { %232 = vst [vmem:[#allocation8] sm:$0xff] %v230_v0  ;;  %233 = vst [vmem:[#allocation8 + $0x8] sm:$0xff] %v231_v1  ;;  %s436_s12 = scalar_lea.vmem %s241_s11, 256  ;;  %p441_p5 = scmp.lt.s32.totalorder %s241_s11, %s241_s11 }
 0x1ed   :  { %p437_p4 = scmp.ne.s32.totalorder %s241_s11, %s436_s12  ;;  %p442_p6 = scmp.lt.s32.totalorder %s436_s12, %s436_s12 }
 0x1ef   :  { %p443_p7 = por %p442_p6, %p441_p5 }
 0x1f1   :  { %p444_p8 = pnand %p443_p7, %p437_p4 }
 0x1f3   :  { %447 = shalt.err (!%p444_p8)
}
 0x1f4   :  { %s448_s14 = scalar_lea.hbm %s563_s3, 256 }
 0x1f5   :  { %p449_p9 = scmp.ne.s32.totalorder %s563_s3, %s448_s14  ;;  %p452_p10 = scmp.lt.u32.totalorder %s448_s14, %s563_s3 }
 0x1f7   :  { %p454_p11 = pnand %p452_p10, %p449_p9 }
 0x1f9   :  { %457 = shalt.err (!%p454_p11)
}
 0x1fa   :  { %243 = dma.vmem_to_hbm [thread:$0]  %s241_s11, 256, %s563_s3, [#allocation4]  }
 0x1fb   :  { %462 = dma.done.wait [#allocation4], 256  }
 0x1fc   :  { %463 = vsyncadd [#allocation4], 4294967040 }
 0x1fd   :  { %464 = dma.done.wait [#allocation10], 128  }
 0x1fe   :  { %465 = vsyncadd [#allocation10], 4294967168 }
 0x1ff   :  { %260 = vsyncpa [#allocation3], 1 }
 0x200   :  { %261 = vsyncpa [#allocation6], 1 }
 0x201   :  { %262 = vsyncpa [#allocation4], 1 }
 0x202   :  { %263 = vsyncpa [#allocation10], 1 }

</bundles_post_ra>
